<compile_context>
chip_gen: v5e
topology: v5e:2x2
jax: 0.10.0
libtpu: 0.0.40
codegen_flags: <defaults>
</compile_context>

<pallas_src>
import functools

import jax
import jax.numpy as jnp
from jax.experimental import pallas as pl
from jax.experimental.pallas import tpu as pltpu

H1 = 128       # fc1 width
H2 = 64        # fc2 logical width
H2_PAD = 128   # fc2 width padded to a full lane register


def qnet_kernel(obs_ref, act_ref, w1o_ref, w1a_ref, b1_ref,
                w2_ref, b2_ref, w3_ref, b3_ref, o_ref):
    # fc1: concat folded into two bf16 MXU matmuls with f32 accumulation.
    h1 = jnp.dot(obs_ref[...], w1o_ref[...], preferred_element_type=jnp.float32)
    h1 = h1 + jnp.dot(act_ref[...], w1a_ref[...], preferred_element_type=jnp.float32)
    h1 = jnp.maximum(h1 + b1_ref[...], 0.0)

    # fc2 (hidden2 zero-padded to 128 lanes): bf16 MXU, f32 bias-add/ReLU.
    h2 = jnp.dot(h1.astype(w2_ref.dtype), w2_ref[...],
                 preferred_element_type=jnp.float32) + b2_ref[...]
    h2 = jnp.maximum(h2, 0.0)

    # fc3: single output column -> VPU multiply + lane reduce (skip the MXU).
    q = jnp.sum(h2 * w3_ref[...], axis=-1, keepdims=True) + b3_ref[...]
    o_ref[...] = q.astype(o_ref.dtype)


def _round_up(x, m):
    return (x + m - 1) // m * m


@functools.partial(jax.jit, static_argnames=("block_rows",))
def qnetwork_forward(obs, act, params, *, block_rows=512):
    """obs: (B, obs_size) f32, act: (B, act_size) f32 -> (B, 1) f32 Q values."""
    w1, b1, w2, b2, w3, b3 = params
    B, obs_size = obs.shape
    act_size = act.shape[1]

    # Split fc1 weight so obs/act never need concatenating in HBM.
    w1o = w1[:obs_size].astype(jnp.bfloat16)          # (obs_size, 128)
    w1a = w1[obs_size:].astype(jnp.bfloat16)          # (act_size, 128)
    b1f = b1.astype(jnp.float32)                      # (1, 128)

    # Zero-pad hidden2 64 -> 128 (lane-full h2); padding does not change math.
    w2p = jnp.pad(w2, ((0, 0), (0, H2_PAD - H2))).astype(jnp.bfloat16)   # (128, 128)
    b2p = jnp.pad(b2, ((0, 0), (0, H2_PAD - H2))).astype(jnp.float32)    # (1, 128)
    w3row = jnp.pad(w3.T, ((0, 0), (0, H2_PAD - H2))).astype(jnp.float32)  # (1, 128)
    b3f = b3.astype(jnp.float32)                      # (1, 1)

    # Batch tiling: tile rows (sublane multiple), pad B up to a tile multiple.
    tb = min(block_rows, _round_up(B, 8))
    b_pad = _round_up(B, tb)
    obs_p = jnp.pad(obs, ((0, b_pad - B), (0, 0))).astype(jnp.bfloat16)
    act_p = jnp.pad(act, ((0, b_pad - B), (0, 0))).astype(jnp.bfloat16)
    num_blocks = b_pad // tb

    batch_tile = lambda i: (i, 0)   # activation / output tiles walk the batch
    resident = lambda i: (0, 0)     # weights & biases stay put in VMEM

    q = pl.pallas_call(
        qnet_kernel,
        out_shape=jax.ShapeDtypeStruct((b_pad, 1), jnp.float32),
        grid=(num_blocks,),
        in_specs=[
            pl.BlockSpec((tb, obs_size), batch_tile),
            pl.BlockSpec((tb, act_size), batch_tile),
            pl.BlockSpec((obs_size, H1), resident),
            pl.BlockSpec((act_size, H1), resident),
            pl.BlockSpec((1, H1), resident),
            pl.BlockSpec((H1, H2_PAD), resident),
            pl.BlockSpec((1, H2_PAD), resident),
            pl.BlockSpec((1, H2_PAD), resident),
            pl.BlockSpec((1, 1), resident),
        ],
        out_specs=pl.BlockSpec((tb, 1), batch_tile),
        compiler_params=pltpu.CompilerParams(
            dimension_semantics=("parallel",)),
    )(obs_p, act_p, w1o, w1a, b1f, w2p, b2p, w3row, b3f)
    # TODO(synk): output stays (B, 1); a lane-dense (num_blocks, TB) writeback
    # would need an in-kernel column->row relayout and the bytes here are tiny.
    return q[:B]


def init_params(key, obs_size, act_size):
    """Deterministic init mimicking nn.Linear's U(-1/sqrt(fan_in), 1/sqrt(fan_in))."""
    d_in = obs_size + act_size
    dims = [(d_in, H1), (H1, H2), (H2, 1)]
    params = []
    for fan_in, fan_out in dims:
        key, kw, kb = jax.random.split(key, 3)
        bound = 1.0 / jnp.sqrt(fan_in)
        w = jax.random.uniform(kw, (fan_in, fan_out), jnp.float32, -bound, bound)
        b = jax.random.uniform(kb, (1, fan_out), jnp.float32, -bound, bound)
        params += [w, b]
    return tuple(params)


def qnetwork_ref_f32(obs, act, params):
    """Pure-JAX f32 reference (matches the PyTorch module exactly)."""
    w1, b1, w2, b2, w3, b3 = params
    x = jnp.concatenate([obs, act], axis=1)
    x = jnp.maximum(x @ w1 + b1, 0.0)
    x = jnp.maximum(x @ w2 + b2, 0.0)
    return x @ w3 + b3


def qnetwork_ref_bf16(obs, act, params):
    """Pure-JAX reference with the kernel's bf16 cast points (tight check)."""
    w1, b1, w2, b2, w3, b3 = params
    x = jnp.concatenate([obs, act], axis=1).astype(jnp.bfloat16)
    h1 = jnp.maximum(
        jnp.dot(x, w1.astype(jnp.bfloat16),
                preferred_element_type=jnp.float32) + b1, 0.0)
    h2 = jnp.maximum(
        jnp.dot(h1.astype(jnp.bfloat16), w2.astype(jnp.bfloat16),
                preferred_element_type=jnp.float32) + b2, 0.0)
    return h2 @ w3 + b3


if __name__ == "__main__":
    key = jax.random.PRNGKey(0)
    B, obs_size, act_size = 8, 16, 4

    k_obs, k_act, k_params = jax.random.split(key, 3)
    obs = jax.random.normal(k_obs, (B, obs_size), jnp.float32)
    act = jax.random.normal(k_act, (B, act_size), jnp.float32)
    params = init_params(k_params, obs_size, act_size)

    q = qnetwork_forward(obs, act, params)
    q = jax.block_until_ready(q)
    assert q.shape == (B, 1)

    q_ref_bf16 = qnetwork_ref_bf16(obs, act, params)
    q_ref_f32 = qnetwork_ref_f32(obs, act, params)
    assert jnp.allclose(q, q_ref_bf16, atol=5e-3, rtol=5e-3)
    assert jnp.allclose(q, q_ref_f32, atol=5e-2, rtol=5e-2)

    print("KERNEL_OK")
</pallas_src>

<mosaic_0001>
module attributes {stable_mosaic.version = 11 : i64} {
  func.func @qnet_kernel(%arg0: i32, %arg1: memref<8x16xbf16, #tpu.memory_space<vmem>>, %arg2: memref<8x4xbf16, #tpu.memory_space<vmem>>, %arg3: memref<16x128xbf16, #tpu.memory_space<vmem>>, %arg4: memref<4x128xbf16, #tpu.memory_space<vmem>>, %arg5: memref<1x128xf32, #tpu.memory_space<vmem>>, %arg6: memref<128x128xbf16, #tpu.memory_space<vmem>>, %arg7: memref<1x128xf32, #tpu.memory_space<vmem>>, %arg8: memref<1x128xf32, #tpu.memory_space<vmem>>, %arg9: memref<1x1xf32, #tpu.memory_space<vmem>>, %arg10: memref<8x1xf32, #tpu.memory_space<vmem>>) attributes {dimension_semantics = [#tpu.dimension_semantics<parallel>], iteration_bounds = array<i64: 1>, scalar_prefetch = 0 : i64, scratch_operands = 0 : i64, tpu.core_type = #tpu.core_type<tc>, window_params = [{transform_indices = @transform_0, window_bounds = array<i64: 8, 16>}, {transform_indices = @transform_1, window_bounds = array<i64: 8, 4>}, {pipeline_mode = #tpu.pipeline_mode<synchronous>, transform_indices = @transform_2, window_bounds = array<i64: 16, 128>}, {pipeline_mode = #tpu.pipeline_mode<synchronous>, transform_indices = @transform_3, window_bounds = array<i64: 4, 128>}, {pipeline_mode = #tpu.pipeline_mode<synchronous>, transform_indices = @transform_4, window_bounds = array<i64: 1, 128>}, {pipeline_mode = #tpu.pipeline_mode<synchronous>, transform_indices = @transform_5, window_bounds = array<i64: 128, 128>}, {pipeline_mode = #tpu.pipeline_mode<synchronous>, transform_indices = @transform_6, window_bounds = array<i64: 1, 128>}, {pipeline_mode = #tpu.pipeline_mode<synchronous>, transform_indices = @transform_7, window_bounds = array<i64: 1, 128>}, {pipeline_mode = #tpu.pipeline_mode<synchronous>, transform_indices = @transform_8, window_bounds = array<i64: 1, 1>}, {transform_indices = @transform_9, window_bounds = array<i64: 8, 1>}]} {
    %c0 = arith.constant 0 : index
    %c0_0 = arith.constant 0 : index
    %0 = vector.load %arg1[%c0, %c0_0] : memref<8x16xbf16, #tpu.memory_space<vmem>>, vector<8x16xbf16>
    %c0_1 = arith.constant 0 : index
    %c0_2 = arith.constant 0 : index
    %1 = vector.load %arg3[%c0_1, %c0_2] : memref<16x128xbf16, #tpu.memory_space<vmem>>, vector<16x128xbf16>
    %cst = arith.constant dense<0.000000e+00> : vector<8x128xf32>
    %2 = tpu.matmul %0, %1, %cst {dimension_numbers = #tpu.dot_dimension_numbers<[1], [0], [0], [1], [0, 0, 1, 1], [], []>} : vector<8x16xbf16>, vector<16x128xbf16>, vector<8x128xf32> -> vector<8x128xf32>
    %c0_3 = arith.constant 0 : index
    %c0_4 = arith.constant 0 : index
    %3 = vector.load %arg2[%c0_3, %c0_4] : memref<8x4xbf16, #tpu.memory_space<vmem>>, vector<8x4xbf16>
    %c0_5 = arith.constant 0 : index
    %c0_6 = arith.constant 0 : index
    %4 = vector.load %arg4[%c0_5, %c0_6] : memref<4x128xbf16, #tpu.memory_space<vmem>>, vector<4x128xbf16>
    %cst_7 = arith.constant dense<0.000000e+00> : vector<8x128xf32>
    %5 = tpu.matmul %3, %4, %cst_7 {dimension_numbers = #tpu.dot_dimension_numbers<[1], [0], [0], [1], [0, 0, 1, 1], [], []>} : vector<8x4xbf16>, vector<4x128xbf16>, vector<8x128xf32> -> vector<8x128xf32>
    %6 = arith.addf %2, %5 : vector<8x128xf32>
    %c0_8 = arith.constant 0 : index
    %c0_9 = arith.constant 0 : index
    %7 = vector.load %arg5[%c0_8, %c0_9] : memref<1x128xf32, #tpu.memory_space<vmem>>, vector<1x128xf32>
    %8 = vector.broadcast %7 : vector<1x128xf32> to vector<8x128xf32>
    %9 = arith.addf %6, %8 : vector<8x128xf32>
    %cst_10 = arith.constant 0.000000e+00 : f32
    %10 = vector.broadcast %cst_10 : f32 to vector<8x128xf32>
    %11 = arith.maximumf %9, %10 : vector<8x128xf32>
    %12 = arith.truncf %11 : vector<8x128xf32> to vector<8x128xbf16>
    %c0_11 = arith.constant 0 : index
    %c0_12 = arith.constant 0 : index
    %13 = vector.load %arg6[%c0_11, %c0_12] : memref<128x128xbf16, #tpu.memory_space<vmem>>, vector<128x128xbf16>
    %cst_13 = arith.constant dense<0.000000e+00> : vector<8x128xf32>
    %14 = tpu.matmul %12, %13, %cst_13 {dimension_numbers = #tpu.dot_dimension_numbers<[1], [0], [0], [1], [0, 0, 1, 1], [], []>} : vector<8x128xbf16>, vector<128x128xbf16>, vector<8x128xf32> -> vector<8x128xf32>
    %c0_14 = arith.constant 0 : index
    %c0_15 = arith.constant 0 : index
    %15 = vector.load %arg7[%c0_14, %c0_15] : memref<1x128xf32, #tpu.memory_space<vmem>>, vector<1x128xf32>
    %16 = vector.broadcast %15 : vector<1x128xf32> to vector<8x128xf32>
    %17 = arith.addf %14, %16 : vector<8x128xf32>
    %cst_16 = arith.constant 0.000000e+00 : f32
    %18 = vector.broadcast %cst_16 : f32 to vector<8x128xf32>
    %19 = arith.maximumf %17, %18 : vector<8x128xf32>
    %c0_17 = arith.constant 0 : index
    %c0_18 = arith.constant 0 : index
    %20 = vector.load %arg8[%c0_17, %c0_18] : memref<1x128xf32, #tpu.memory_space<vmem>>, vector<1x128xf32>
    %21 = vector.broadcast %20 : vector<1x128xf32> to vector<8x128xf32>
    %22 = arith.mulf %19, %21 : vector<8x128xf32>
    %cst_19 = arith.constant dense<0.000000e+00> : vector<8xf32>
    %23 = vector.multi_reduction <add>, %22, %cst_19 [1] : vector<8x128xf32> to vector<8xf32>
    %24 = vector.shape_cast %23 : vector<8xf32> to vector<8x1xf32>
    %c0_20 = arith.constant 0 : index
    %c0_21 = arith.constant 0 : index
    %25 = vector.load %arg9[%c0_20, %c0_21] : memref<1x1xf32, #tpu.memory_space<vmem>>, vector<1x1xf32>
    %26 = vector.broadcast %25 : vector<1x1xf32> to vector<8x1xf32>
    %27 = arith.addf %24, %26 : vector<8x1xf32>
    %c0_22 = arith.constant 0 : index
    %c0_23 = arith.constant 0 : index
    %28 = vector.load %arg10[%c0_22, %c0_23] : memref<8x1xf32, #tpu.memory_space<vmem>>, vector<8x1xf32>
    tpu.vector_store %arg10[%c0_22, %c0_23], %27 {strides = array<i32>} : memref<8x1xf32, #tpu.memory_space<vmem>>, vector<8x1xf32>,
    return
  }
  func.func @transform_0(%arg0: i32) -> (i32, i32) {
    %c0_i32 = arith.constant 0 : i32
    %c0_i32_0 = arith.constant 0 : i32
    return %arg0, %c0_i32 : i32, i32
  }
  func.func @transform_1(%arg0: i32) -> (i32, i32) {
    %c0_i32 = arith.constant 0 : i32
    %c0_i32_0 = arith.constant 0 : i32
    return %arg0, %c0_i32 : i32, i32
  }
  func.func @transform_2(%arg0: i32) -> (i32, i32) {
    %c0_i32 = arith.constant 0 : i32
    %c0_i32_0 = arith.constant 0 : i32
    %c0_i32_1 = arith.constant 0 : i32
    return %c0_i32, %c0_i32_0 : i32, i32
  }
  func.func @transform_3(%arg0: i32) -> (i32, i32) {
    %c0_i32 = arith.constant 0 : i32
    %c0_i32_0 = arith.constant 0 : i32
    %c0_i32_1 = arith.constant 0 : i32
    return %c0_i32, %c0_i32_0 : i32, i32
  }
  func.func @transform_4(%arg0: i32) -> (i32, i32) {
    %c0_i32 = arith.constant 0 : i32
    %c0_i32_0 = arith.constant 0 : i32
    %c0_i32_1 = arith.constant 0 : i32
    return %c0_i32, %c0_i32_0 : i32, i32
  }
  func.func @transform_5(%arg0: i32) -> (i32, i32) {
    %c0_i32 = arith.constant 0 : i32
    %c0_i32_0 = arith.constant 0 : i32
    %c0_i32_1 = arith.constant 0 : i32
    return %c0_i32, %c0_i32_0 : i32, i32
  }
  func.func @transform_6(%arg0: i32) -> (i32, i32) {
    %c0_i32 = arith.constant 0 : i32
    %c0_i32_0 = arith.constant 0 : i32
    %c0_i32_1 = arith.constant 0 : i32
    return %c0_i32, %c0_i32_0 : i32, i32
  }
  func.func @transform_7(%arg0: i32) -> (i32, i32) {
    %c0_i32 = arith.constant 0 : i32
    %c0_i32_0 = arith.constant 0 : i32
    %c0_i32_1 = arith.constant 0 : i32
    return %c0_i32, %c0_i32_0 : i32, i32
  }
  func.func @transform_8(%arg0: i32) -> (i32, i32) {
    %c0_i32 = arith.constant 0 : i32
    %c0_i32_0 = arith.constant 0 : i32
    %c0_i32_1 = arith.constant 0 : i32
    return %c0_i32, %c0_i32_0 : i32, i32
  }
  func.func @transform_9(%arg0: i32) -> (i32, i32) {
    %c0_i32 = arith.constant 0 : i32
    %c0_i32_0 = arith.constant 0 : i32
    return %arg0, %c0_i32 : i32, i32
  }
}

</mosaic_0001>

<bundles_post_ra>
// kernel: qnetwork_forward.1
= control target key start
LH: loop header
LB: loop body
LE: loop exit
PB: predicated region body
PF: predicated region fallthrough
CT: control target
= control target key end

     0   :  { %vm44_vm0 = vcmask 1041408   ;;  %vm40_vm1 = vcmask 31744   ;;  %vm67_vm2 = vcmask 130048   ;;  %vm185_vm3 = vcmask 7168   ;;  %s343_s3 = inlined_call_operand.vmem [shape: bf16[4,128], index: 3, kind: input, shape index: {}]   ;;  %s344_s2 = inlined_call_operand.vmem [shape: bf16[16,128], index: 2, kind: input, shape index: {}]   ;;  %s345_s1 = inlined_call_operand.vmem [shape: bf16[8,4], index: 1, kind: input, shape index: {}]   ;;  %s346_s0 = inlined_call_operand.vmem [shape: bf16[8,16], index: 0, kind: input, shape index: {}]   ;;  %s347_s5 = inlined_call_operand.vmem [shape: bf16[128,128], index: 5, kind: input, shape index: {}]   ;;  %s348_s4 = inlined_call_operand.vmem [shape: f32[1,128], index: 4, kind: input, shape index: {}]   ;;  %s349_s6 = inlined_call_operand.vmem [shape: f32[1,128], index: 6, kind: input, shape index: {}]   ;;  %s350_s7 = inlined_call_operand.vmem [shape: f32[1,128], index: 7, kind: input, shape index: {}]   ;;  %s351_s8 = inlined_call_operand.<no memory space> [shape: f32[1,1], index: 8, kind: input, shape index: {}]   ;;  %s352_s9 = inlined_call_operand.vmem [shape: f32[8,1], index: 9, kind: output, shape index: {}]  }
   0x1   :  { %v39_v0 = vld [vmem:[%s343_s3] sm:$0x3]  ;;  %v237_v3 = vld [vmem:[%s347_s5 + $0x38] sm:$0xff]  ;;  %v236_v6 = vld [vmem:[%s347_s5 + $0x30] sm:$0xff]  ;;  %v14_v22 = vstv %s351_s8 }
   0x2   :  { %v229_v1 = vld [vmem:[%s344_s2] sm:$0xff]  ;;  %v46_v2 = vsel %vm44_vm0, %v39_v0, 0  ;;  %159 = vmatpush.bf16.msra.mxu2 %v237_v3  ;;  %v235_v7 = vld [vmem:[%s347_s5 + $0x28] sm:$0xff]  ;;  %v233_v9 = vld [vmem:[%s347_s5 + $0x18] sm:$0xff]  ;;  %15 = vst [vmem:[#allocation2] sm:$0x1] %v14_v22 }
   0x3   :  { %55 = vmatpush.bf16.msra.mxu0 %v46_v2  ;;  %78 = vmatpush.bf16.msra.mxu1 %v229_v1  ;;  %v38_v4 = vld [vmem:[%s345_s1] sm:$0xf]  ;;  %v232_v10 = vld [vmem:[%s347_s5 + $0x10] sm:$0xff]  ;;  %v231_v11 = vld [vmem:[%s347_s5 + $0x8] sm:$0xff] }
   0x4   :  { %v35_v5 = vld [vmem:[%s346_s0] sm:$0xf] }
   0x5   :  { %v234_v8 = vld [vmem:[%s347_s5 + $0x20] sm:$0xff] }
   0x6   :  { %191 = vmatmul.msk.bf16.vlgmr.msra.gmra.mxu0 %vm40_vm1, %v38_v4  ;;  %196 = vmatmul.msk.bf16.vlgmr.msra.gmra.mxu1 %vm67_vm2, %v35_v5  ;;  %v230_v12 = vld [vmem:[%s347_s5] sm:$0xff] }
   0x7   :  { %160 = vmatpush.bf16.msra.mxu2 %v236_v6  ;;  %v238_v13 = vld [vmem:[%s348_s4] ss:$0 sm:$0xff] }
   0x8   :  { %v239_v23 = vld [vmem:[%s349_s6] ss:$0 sm:$0xff] }
   0x9   :  { %v240_v26 = vld [vmem:[%s350_s7] ss:$0 sm:$0xff] }
   0xa   :  { %v241_v30 = vld [vmem:[#allocation2] ss:$0 sm:$0xff] }
   0xb   :  { %161 = vmatpush.bf16.msra.mxu2 %v235_v7 }
   0xf   :  { %162 = vmatpush.bf16.msra.mxu2 %v234_v8 }
  0x13   :  { %163 = vmatpush.bf16.msra.mxu2 %v233_v9 }
  0x17   :  { %164 = vmatpush.bf16.msra.mxu2 %v232_v10 }
  0x1b   :  { %165 = vmatpush.bf16.msra.mxu2 %v231_v11 }
  0x1f   :  { %166 = vmatpush.bf16.msra.mxu2 %v230_v12 }
  0x83   :  { %v57_v14 = vpop.f32.mrf.mxu0  ;;  %v80_v15 = vpop.f32.mrf.mxu1 }
  0x84   :  { %v81_v16 = vadd.f32 %v80_v15, %v57_v14 }
  0x86   :  { %v88_v17 = vadd.f32 %v238_v13, %v81_v16 }
  0x88   :  { %v89_v18 = vmax.f32 %v88_v17, 0.0 }
  0x8a   :  { %v90_v19 = vpack.c.bf16 %v89_v18, %v89_v18 }
  0x8b   :  { %v59_v20 = vpop.f32.mrf.mxu0  ;;  %v82_v21 = vpop.f32.mrf.mxu1 }
  0x8c   :  { %167 = vmatmul.bf16.vlgmr.msra.gmra.mxu2 %v90_v19 }
 0x10f   :  { %v168_v24 = vpop.f32.mrf.mxu2 }
 0x110   :  { %v169_v25 = vadd.f32 %v239_v23, %v168_v24 }
 0x112   :  { %v172_v27 = vmax.f32 %v169_v25, 0.0 }
 0x114   :  { %v177_v28 = vmul.f32 %v240_v26, %v172_v27 }
 0x116   :  { %178 = vadd.xlane.f32.xlu0 %v177_v28 }
 0x117   :  { %v170_v29 = vpop.f32.mrf.mxu2 }
 0x189   :  { %v179_v31 = vpop.xlane.xlu0 %178 }
 0x18a   :  { %v184_v32 = vadd.f32 %v241_v30, %v179_v31 }
 0x18c   :  { %186 = vst.msk [vmem:[%s352_s9] sm:$0xff] %vm185_vm3, %v184_v32 }

</bundles_post_ra>
